<compile_context>
chip_gen: v7x
topology: tpu7x:2x2x1
jax: 0.10.0
libtpu: 0.0.40
codegen_flags: <defaults>
</compile_context>

<pallas_src>
from functools import partial

import jax
import jax.numpy as jnp
from jax.experimental import pallas as pl
from jax.experimental.pallas import tpu as pltpu


def _make_kernel(inv_h, eps, matmul_dtype):
    def kernel(x_ref, m_ref, ab_ref, gb_ref, seg_ref, segt_ref, o_ref):
        # x_ref:    (S, TN)   lane-folded input slab, TN = Bt*H
        # m_ref:    (S, S)    low-pass projection matrix (matmul_dtype)
        # ab_ref:   (2, TN)   row0 = 1 - beta^2, row1 = 1 + beta^2 (tiled over Bt)
        # gb_ref:   (2, TN)   row0 = LN gamma,   row1 = LN bias    (tiled over Bt)
        # seg_ref:  (TN, Bp)  one-hot segment indicator (column c -> segment c//H)
        # segt_ref: (Bp, TN)  its transpose (broadcast back per segment)
        x = x_ref[...]

        # low_pass = irfft(mask * rfft(x, dim=seq)) == M @ x   (MXU, f32 accumulate)
        low = jnp.dot(m_ref[...], x.astype(matmul_dtype),
                      preferred_element_type=jnp.float32)             # (S, TN) f32

        xf = x.astype(jnp.float32)
        a = ab_ref[0:1, :]                                             # (1, TN)
        b = ab_ref[1:2, :]
        # z = low + beta^2*(x - low) + x == (1-beta^2)*low + (1+beta^2)*x
        z = a * low + b * xf                                           # (S, TN) f32

        # Segmented LayerNorm over each H-wide lane group (one group per batch
        # element).  f32 dots against the 0/1 indicator keep full precision and
        # avoid in-kernel reshapes.
        seg = seg_ref[...]                                             # (TN, Bp)
        segt = segt_ref[...]                                           # (Bp, TN)
        seg_sum = jnp.dot(z, seg, preferred_element_type=jnp.float32)  # (S, Bp)
        mean = jnp.dot(seg_sum * inv_h, segt,
                       preferred_element_type=jnp.float32)             # (S, TN)
        zc = z - mean
        var = jnp.dot(zc * zc, seg, preferred_element_type=jnp.float32) * inv_h
        rstd = jnp.dot(jax.lax.rsqrt(var + eps), segt,
                       preferred_element_type=jnp.float32)             # (S, TN)

        gamma = gb_ref[0:1, :]
        bias = gb_ref[1:2, :]
        o_ref[...] = (zc * rstd * gamma + bias).astype(o_ref.dtype)    # lane-dense store

    return kernel


def _choose_batch_tile(batch, hidden, target_lanes=512):
    """Largest batch tile whose folded lane width (Bt*H) is a legal, modest block."""
    target = max(target_lanes, hidden)
    if batch * hidden <= target:
        return batch                       # full-width block: always legal
    candidates = [bt for bt in range(1, batch + 1)
                  if batch % bt == 0
                  and (bt * hidden) % 128 == 0
                  and bt * hidden <= target]
    return max(candidates) if candidates else batch


@partial(jax.jit, static_argnames=("matmul_dtype", "batch_tile"))
def frequency_layer(input_tensor, nfft_mask, *, low_pass_mat, beta, ln_weight,
                    ln_bias, matmul_dtype=jnp.bfloat16, batch_tile=None):
    # nfft_mask is accepted for API parity but unused (same as the PyTorch forward).
    del nfft_mask
    B, S, H = input_tensor.shape
    Bt = batch_tile if batch_tile is not None else _choose_batch_tile(B, H)
    assert B % Bt == 0
    TN = Bt * H
    Bp = ((Bt + 7) // 8) * 8               # pad segment axis to a full sublane group

    # Fold batch into the lane dimension: (B, S, H) -> (S, B*H).  Layout plumbing
    # only; it buys a lane-dense output slab and one wide MXU dot per grid step.
    xt = jnp.reshape(jnp.transpose(input_tensor, (1, 0, 2)), (S, B * H))

    beta2 = jnp.reshape(beta.astype(jnp.float32), (H,)) ** 2
    ab = jnp.stack([jnp.tile(1.0 - beta2, Bt),
                    jnp.tile(1.0 + beta2, Bt)], axis=0)                  # (2, TN)
    gb = jnp.stack([jnp.tile(jnp.reshape(ln_weight.astype(jnp.float32), (H,)), Bt),
                    jnp.tile(jnp.reshape(ln_bias.astype(jnp.float32), (H,)), Bt)],
                   axis=0)                                               # (2, TN)

    # One-hot segment indicator: column c belongs to batch segment c // H.
    col = jnp.arange(TN) // H
    seg = (col[:, None] == jnp.arange(Bp)[None, :]).astype(jnp.float32)  # (TN, Bp)
    segt = seg.T                                                         # (Bp, TN)

    m = low_pass_mat.astype(matmul_dtype)                                # (S, S)

    # Explicit VMEM budget: double-buffered in/out slabs + single-copy invariants.
    itemsize = jnp.dtype(input_tensor.dtype).itemsize
    resident = (4 * S * TN * itemsize
                + S * S * jnp.dtype(matmul_dtype).itemsize
                + (4 * TN + 2 * TN * Bp) * 4)
    vmem_limit = int(min(64 * 1024 * 1024, max(32 * 1024 * 1024, 2 * resident)))

    kernel = _make_kernel(1.0 / H, 1e-12, matmul_dtype)

    out_t = pl.pallas_call(
        kernel,
        out_shape=jax.ShapeDtypeStruct((S, B * H), input_tensor.dtype),
        grid_spec=pltpu.PrefetchScalarGridSpec(
            num_scalar_prefetch=0,
            grid=(B // Bt,),
            in_specs=[
                pl.BlockSpec((S, TN), lambda j: (0, j)),                   # x slab
                pl.BlockSpec(memory_space=pltpu.MemorySpace.VMEM),         # M (whole)
                pl.BlockSpec(memory_space=pltpu.MemorySpace.VMEM),         # ab
                pl.BlockSpec(memory_space=pltpu.MemorySpace.VMEM),         # gb
                pl.BlockSpec(memory_space=pltpu.MemorySpace.VMEM),         # seg
                pl.BlockSpec(memory_space=pltpu.MemorySpace.VMEM),         # seg^T
            ],
            out_specs=pl.BlockSpec((S, TN), lambda j: (0, j)),
        ),
        compiler_params=pltpu.CompilerParams(
            dimension_semantics=("parallel",),
            vmem_limit_bytes=vmem_limit,
        ),
    )(xt, m, ab, gb, seg, segt)

    # Unfold lanes back to (B, S, H).
    return jnp.transpose(jnp.reshape(out_t, (S, B, H)), (1, 0, 2))


def build_low_pass_matrix(seq_len, c_param):
    """M such that M @ x == irfft(mask * rfft(x, norm='ortho'), n=seq_len, norm='ortho')."""
    c_cut = c_param // 2 + 1                       # self.c in the module
    eye = jnp.eye(seq_len, dtype=jnp.float32)
    X = jnp.fft.rfft(eye, axis=0, norm="ortho")                   # (S//2+1, S)
    mask = (jnp.arange(seq_len // 2 + 1) < c_cut)[:, None]
    M = jnp.fft.irfft(X * mask, n=seq_len, axis=0, norm="ortho")  # (S, S)
    return M.astype(jnp.float32)


def reference_forward(x, beta, ln_weight, ln_bias, c_param):
    """Plain-JAX f32 reference mirroring the PyTorch module (eval mode)."""
    B, S, H = x.shape
    c_cut = c_param // 2 + 1
    xf = jnp.fft.rfft(x, axis=1, norm="ortho")
    mask = (jnp.arange(S // 2 + 1) < c_cut)[None, :, None]
    low = jnp.fft.irfft(xf * mask, n=S, axis=1, norm="ortho")
    high = x - low
    y = low + (beta ** 2) * high
    z = y + x
    mean = jnp.mean(z, axis=-1, keepdims=True)
    var = jnp.mean((z - mean) ** 2, axis=-1, keepdims=True)
    return (z - mean) / jnp.sqrt(var + 1e-12) * ln_weight + ln_bias


def reference_forward_matched(x, beta, ln_weight, ln_bias, low_pass_mat, matmul_dtype):
    """Reference mirroring the kernel's quantization: matmul_dtype inputs, f32 math."""
    B, S, H = x.shape
    m = low_pass_mat.astype(matmul_dtype).astype(jnp.float32)
    xq = x.astype(matmul_dtype).astype(jnp.float32)
    low = jnp.einsum("st,bth->bsh", m, xq, precision=jax.lax.Precision.HIGHEST)
    beta2 = jnp.reshape(beta.astype(jnp.float32), (1, 1, H)) ** 2
    z = (1.0 - beta2) * low + (1.0 + beta2) * x
    mean = jnp.mean(z, axis=-1, keepdims=True)
    zc = z - mean
    var = jnp.mean(zc * zc, axis=-1, keepdims=True)
    return zc / jnp.sqrt(var + 1e-12) * ln_weight + ln_bias


if __name__ == "__main__":
    # Small shapes consistent with the module: (batch, seq_len, hidden)
    B, S, H = 2, 16, 64
    C_PARAM = 5                       # module's `c`; self.c = c//2 + 1 = 3

    key = jax.random.PRNGKey(0)
    k_x, k_beta = jax.random.split(key)

    x = jax.random.normal(k_x, (B, S, H), dtype=jnp.float32)
    nfft_mask = jnp.ones((B, S), dtype=jnp.float32)          # unused by the forward

    # Deterministic parameter init (shapes from __init__)
    beta = jax.random.normal(k_beta, (1, 1, H), dtype=jnp.float32)   # nn.Parameter(randn)
    ln_weight = jnp.ones((H,), dtype=jnp.float32)                    # LayerNorm defaults
    ln_bias = jnp.zeros((H,), dtype=jnp.float32)

    M = build_low_pass_matrix(S, C_PARAM)

    # Sanity: the precomputed projection matrix reproduces the FFT low-pass exactly.
    low_mat = jnp.einsum("st,bth->bsh", M, x, precision=jax.lax.Precision.HIGHEST)
    xf = jnp.fft.rfft(x, axis=1, norm="ortho")
    fmask = (jnp.arange(S // 2 + 1) < (C_PARAM // 2 + 1))[None, :, None]
    low_fft = jnp.fft.irfft(xf * fmask, n=S, axis=1, norm="ortho")
    assert jnp.allclose(low_mat, low_fft, atol=1e-4, rtol=1e-4), \
        float(jnp.max(jnp.abs(low_mat - low_fft)))

    # Kernel run (bf16 MXU path — the default / perf configuration).
    out = frequency_layer(x, nfft_mask,
                          low_pass_mat=M, beta=beta,
                          ln_weight=ln_weight, ln_bias=ln_bias)
    out = jax.block_until_ready(out)
    assert out.shape == (B, S, H)

    # Tight check vs a reference that uses the same bf16 matmul inputs.
    ref_matched = reference_forward_matched(x, beta, ln_weight, ln_bias, M, jnp.bfloat16)
    err_matched = float(jnp.max(jnp.abs(out - ref_matched)))
    assert jnp.allclose(out, ref_matched, atol=2e-3, rtol=2e-3), err_matched

    # Loose sanity check vs the pure-f32 torch math (bf16 MXU inputs perturb slightly).
    ref_f32 = reference_forward(x, beta, ln_weight, ln_bias, C_PARAM)
    err_f32 = float(jnp.max(jnp.abs(out - ref_f32)))
    assert jnp.allclose(out, ref_f32, atol=3e-1, rtol=1e-1), err_f32

    print("KERNEL_OK")
</pallas_src>

<mosaic_0001>
module attributes {stable_mosaic.version = 11 : i64} {
  func.func @kernel(%arg0: i32, %arg1: memref<16x128xf32, #tpu.memory_space<vmem>>, %arg2: memref<16x16xbf16, #tpu.memory_space<vmem>>, %arg3: memref<2x128xf32, #tpu.memory_space<vmem>>, %arg4: memref<2x128xf32, #tpu.memory_space<vmem>>, %arg5: memref<128x8xf32, #tpu.memory_space<vmem>>, %arg6: memref<8x128xf32, #tpu.memory_space<vmem>>, %arg7: memref<16x128xf32, #tpu.memory_space<vmem>>) attributes {dimension_semantics = [#tpu.dimension_semantics<parallel>], iteration_bounds = array<i64: 1>, scalar_prefetch = 0 : i64, scratch_operands = 0 : i64, tpu.core_type = #tpu.core_type<tc>, window_params = [{transform_indices = @transform_0, window_bounds = array<i64: 16, 128>}, {pipeline_mode = #tpu.pipeline_mode<synchronous>, transform_indices = @transform_1, window_bounds = array<i64: 16, 16>}, {pipeline_mode = #tpu.pipeline_mode<synchronous>, transform_indices = @transform_2, window_bounds = array<i64: 2, 128>}, {pipeline_mode = #tpu.pipeline_mode<synchronous>, transform_indices = @transform_3, window_bounds = array<i64: 2, 128>}, {pipeline_mode = #tpu.pipeline_mode<synchronous>, transform_indices = @transform_4, window_bounds = array<i64: 128, 8>}, {pipeline_mode = #tpu.pipeline_mode<synchronous>, transform_indices = @transform_5, window_bounds = array<i64: 8, 128>}, {transform_indices = @transform_6, window_bounds = array<i64: 16, 128>}]} {
    %c0 = arith.constant 0 : index
    %c0_0 = arith.constant 0 : index
    %0 = vector.load %arg1[%c0, %c0_0] : memref<16x128xf32, #tpu.memory_space<vmem>>, vector<16x128xf32>
    %c0_1 = arith.constant 0 : index
    %c0_2 = arith.constant 0 : index
    %1 = vector.load %arg2[%c0_1, %c0_2] : memref<16x16xbf16, #tpu.memory_space<vmem>>, vector<16x16xbf16>
    %2 = arith.truncf %0 : vector<16x128xf32> to vector<16x128xbf16>
    %cst = arith.constant dense<0.000000e+00> : vector<16x128xf32>
    %3 = tpu.matmul %1, %2, %cst {dimension_numbers = #tpu.dot_dimension_numbers<[1], [0], [0], [1], [0, 0, 1, 1], [], []>} : vector<16x16xbf16>, vector<16x128xbf16>, vector<16x128xf32> -> vector<16x128xf32>
    %c0_3 = arith.constant 0 : index
    %c0_4 = arith.constant 0 : index
    %4 = vector.load %arg3[%c0_3, %c0_4] : memref<2x128xf32, #tpu.memory_space<vmem>>, vector<1x128xf32>
    %c1 = arith.constant 1 : index
    %c0_5 = arith.constant 0 : index
    %5 = vector.load %arg3[%c1, %c0_5] : memref<2x128xf32, #tpu.memory_space<vmem>>, vector<1x128xf32>
    %6 = vector.broadcast %4 : vector<1x128xf32> to vector<16x128xf32>
    %7 = arith.mulf %6, %3 : vector<16x128xf32>
    %8 = vector.broadcast %5 : vector<1x128xf32> to vector<16x128xf32>
    %9 = arith.mulf %8, %0 : vector<16x128xf32>
    %10 = arith.addf %7, %9 : vector<16x128xf32>
    %c0_6 = arith.constant 0 : index
    %c0_7 = arith.constant 0 : index
    %11 = vector.load %arg5[%c0_6, %c0_7] : memref<128x8xf32, #tpu.memory_space<vmem>>, vector<128x8xf32>
    %c0_8 = arith.constant 0 : index
    %c0_9 = arith.constant 0 : index
    %12 = vector.load %arg6[%c0_8, %c0_9] : memref<8x128xf32, #tpu.memory_space<vmem>>, vector<8x128xf32>
    %cst_10 = arith.constant dense<0.000000e+00> : vector<16x8xf32>
    %13 = tpu.matmul %10, %11, %cst_10 {dimension_numbers = #tpu.dot_dimension_numbers<[1], [0], [0], [1], [0, 0, 1, 1], [], []>} : vector<16x128xf32>, vector<128x8xf32>, vector<16x8xf32> -> vector<16x8xf32>
    %cst_11 = arith.constant 1.562500e-02 : f32
    %14 = vector.broadcast %cst_11 : f32 to vector<16x8xf32>
    %15 = arith.mulf %13, %14 : vector<16x8xf32>
    %cst_12 = arith.constant dense<0.000000e+00> : vector<16x128xf32>
    %16 = tpu.matmul %15, %12, %cst_12 {dimension_numbers = #tpu.dot_dimension_numbers<[1], [0], [0], [1], [0, 0, 1, 1], [], []>} : vector<16x8xf32>, vector<8x128xf32>, vector<16x128xf32> -> vector<16x128xf32>
    %17 = arith.subf %10, %16 : vector<16x128xf32>
    %18 = arith.mulf %17, %17 : vector<16x128xf32>
    %cst_13 = arith.constant dense<0.000000e+00> : vector<16x8xf32>
    %19 = tpu.matmul %18, %11, %cst_13 {dimension_numbers = #tpu.dot_dimension_numbers<[1], [0], [0], [1], [0, 0, 1, 1], [], []>} : vector<16x128xf32>, vector<128x8xf32>, vector<16x8xf32> -> vector<16x8xf32>
    %cst_14 = arith.constant 1.562500e-02 : f32
    %20 = vector.broadcast %cst_14 : f32 to vector<16x8xf32>
    %21 = arith.mulf %19, %20 : vector<16x8xf32>
    %cst_15 = arith.constant 9.99999996E-13 : f32
    %22 = vector.broadcast %cst_15 : f32 to vector<16x8xf32>
    %23 = arith.addf %21, %22 : vector<16x8xf32>
    %24 = math.rsqrt %23 : vector<16x8xf32>
    %cst_16 = arith.constant dense<0.000000e+00> : vector<16x128xf32>
    %25 = tpu.matmul %24, %12, %cst_16 {dimension_numbers = #tpu.dot_dimension_numbers<[1], [0], [0], [1], [0, 0, 1, 1], [], []>} : vector<16x8xf32>, vector<8x128xf32>, vector<16x128xf32> -> vector<16x128xf32>
    %c0_17 = arith.constant 0 : index
    %c0_18 = arith.constant 0 : index
    %26 = vector.load %arg4[%c0_17, %c0_18] : memref<2x128xf32, #tpu.memory_space<vmem>>, vector<1x128xf32>
    %c1_19 = arith.constant 1 : index
    %c0_20 = arith.constant 0 : index
    %27 = vector.load %arg4[%c1_19, %c0_20] : memref<2x128xf32, #tpu.memory_space<vmem>>, vector<1x128xf32>
    %28 = arith.mulf %17, %25 : vector<16x128xf32>
    %29 = vector.broadcast %26 : vector<1x128xf32> to vector<16x128xf32>
    %30 = arith.mulf %28, %29 : vector<16x128xf32>
    %31 = vector.broadcast %27 : vector<1x128xf32> to vector<16x128xf32>
    %32 = arith.addf %30, %31 : vector<16x128xf32>
    %c0_21 = arith.constant 0 : index
    %c0_22 = arith.constant 0 : index
    %33 = vector.load %arg7[%c0_21, %c0_22] : memref<16x128xf32, #tpu.memory_space<vmem>>, vector<16x128xf32>
    tpu.vector_store %arg7[%c0_21, %c0_22], %32 {strides = array<i32>} : memref<16x128xf32, #tpu.memory_space<vmem>>, vector<16x128xf32>,
    return
  }
  func.func @transform_0(%arg0: i32) -> (i32, i32) {
    %c0_i32 = arith.constant 0 : i32
    %c0_i32_0 = arith.constant 0 : i32
    return %c0_i32, %arg0 : i32, i32
  }
  func.func @transform_1(%arg0: i32) -> (i32, i32) {
    %c0_i32 = arith.constant 0 : i32
    %c0_i32_0 = arith.constant 0 : i32
    %c0_i32_1 = arith.constant 0 : i32
    return %c0_i32, %c0_i32_0 : i32, i32
  }
  func.func @transform_2(%arg0: i32) -> (i32, i32) {
    %c0_i32 = arith.constant 0 : i32
    %c0_i32_0 = arith.constant 0 : i32
    %c0_i32_1 = arith.constant 0 : i32
    return %c0_i32, %c0_i32_0 : i32, i32
  }
  func.func @transform_3(%arg0: i32) -> (i32, i32) {
    %c0_i32 = arith.constant 0 : i32
    %c0_i32_0 = arith.constant 0 : i32
    %c0_i32_1 = arith.constant 0 : i32
    return %c0_i32, %c0_i32_0 : i32, i32
  }
  func.func @transform_4(%arg0: i32) -> (i32, i32) {
    %c0_i32 = arith.constant 0 : i32
    %c0_i32_0 = arith.constant 0 : i32
    %c0_i32_1 = arith.constant 0 : i32
    return %c0_i32, %c0_i32_0 : i32, i32
  }
  func.func @transform_5(%arg0: i32) -> (i32, i32) {
    %c0_i32 = arith.constant 0 : i32
    %c0_i32_0 = arith.constant 0 : i32
    %c0_i32_1 = arith.constant 0 : i32
    return %c0_i32, %c0_i32_0 : i32, i32
  }
  func.func @transform_6(%arg0: i32) -> (i32, i32) {
    %c0_i32 = arith.constant 0 : i32
    %c0_i32_0 = arith.constant 0 : i32
    return %c0_i32, %arg0 : i32, i32
  }
}

</mosaic_0001>

<bundles_post_ra>
// kernel: tile.37
= control target key start
LH: loop header
LB: loop body
LE: loop exit
PB: predicated region body
PF: predicated region fallthrough
CT: control target
= control target key end

     0   :  { %s22_s0 = inlined_call_operand.vmem [shape: f32[64], index: 0, kind: input, shape index: {}]   ;;  %s23_s1 = inlined_call_operand.vmem [shape: f32[2,64], index: 1, kind: output, shape index: {}]  }
   0x1   :  { %v4_v0 = vld [vmem:[%s22_s0] ss:$0 sm:$0xff] }
   0x2   :  { %5 = vst [vmem:[%s23_s1] sm:$0x3] %v4_v0 }

// kernel: tile.39
= control target key start
LH: loop header
LB: loop body
LE: loop exit
PB: predicated region body
PF: predicated region fallthrough
CT: control target
= control target key end

     0   :  { %vm7_vm0 = vcmask 523264   ;;  %vm13_vm1 = vcmask 1048064   ;;  %s39_s0 = inlined_call_operand.vmem [shape: f32[2,64], index: 0, kind: input, shape index: {}]   ;;  %s40_s1 = inlined_call_operand.vmem [shape: f32[1,128], index: 1, kind: output, shape index: {}]  }
   0x1   :  { %v4_v0 = vld [vmem:[%s39_s0] sm:$0x3]  ;;  %s22_s0 = smov 64  }
   0x2   :  { %5 = vst [vmem:[#allocation1] sm:$0x3] %v4_v0 }
   0x9   :  { %v10_v1 = vld [vmem:[#allocation1 + $0x1] sm:$0x1]   ;;  %v6_v2 = vld [vmem:[#allocation1] sm:$0x1]  }
   0xa   :  { %11 = vrot.lane.b32.xlu0 %v10_v1, %s22_s0  ;;  %8 = vst.msk [vmem:[#allocation0] sm:$0x1] %vm7_vm0, %v6_v2  }
  0x7c   :  { %v12_v3 = vpop.permute.xlu0 %11  }
  0x7d   :  { %14 = vst.msk [vmem:[#allocation0] sm:$0x1] %vm13_vm1, %v12_v3  }
  0x84   :  { %v18_v4 = vld [vmem:[#allocation0] sm:$0x1] }
  0x85   :  { %20 = vst [vmem:[%s40_s1] sm:$0x1] %v18_v4 }

// kernel: frequency_layer.1
= control target key start
LH: loop header
LB: loop body
LE: loop exit
PB: predicated region body
PF: predicated region fallthrough
CT: control target
= control target key end

     0   :  { %v670_v0 = vmov 0.0   ;;  %vm671_vm0 = vmmov 0   ;;  %vm34_vm1 = vcmask 130048   ;;  %vm189_vm2 = vcmask 64512   ;;  %s801_s0 = inlined_call_operand.vmem [shape: f32[16,128], index: 0, kind: input, shape index: {}]   ;;  %s802_s1 = inlined_call_operand.vmem [shape: bf16[16,16], index: 1, kind: input, shape index: {}]   ;;  %s803_s4 = inlined_call_operand.vmem [shape: f32[128,8], index: 4, kind: input, shape index: {}]   ;;  %s804_s2 = inlined_call_operand.vmem [shape: f32[2,128], index: 2, kind: input, shape index: {}]   ;;  %s805_s5 = inlined_call_operand.vmem [shape: f32[8,128], index: 5, kind: input, shape index: {}]   ;;  %s806_s3 = inlined_call_operand.vmem [shape: f32[2,128], index: 3, kind: input, shape index: {}]   ;;  %s807_s6 = inlined_call_operand.vmem [shape: f32[16,128], index: 6, kind: output, shape index: {}]  }
   0x1   :  { %513 = vmatprep.subr.bf16.mxu1 %v670_v0  ;;  %v24_v1 = vld [vmem:[%s801_s0] sm:$0xff]  ;;  %v25_v2 = vld [vmem:[%s801_s0 + $0x8] sm:$0xff]  ;;  %515 = vmatprep.mubr.msk.bf16.mxu1 %vm671_vm0, %v670_v0  ;;  %v97_v7 = vld [vmem:[%s803_s4 + $0x10] sm:$0xff] }
   0x2   :  { %v28_v3 = vpack.c.bf16 %v25_v2, %v24_v1  ;;  %v665_v4 = vld [vmem:[%s802_s1] sm:$0xff]   ;;  %v96_v6 = vld [vmem:[%s803_s4 + $0x8] sm:$0xff]  ;;  %v98_v8 = vld [vmem:[%s803_s4 + $0x18] sm:$0xff] }
   0x3   :  { %v95_v5 = vld [vmem:[%s803_s4] sm:$0xff]  ;;  %v730_v10 = vpack.c.bf16 %v98_v8, %v97_v7  ;;  %v100_v12 = vld [vmem:[%s803_s4 + $0x28] sm:$0xff]  ;;  %v101_v14 = vld [vmem:[%s803_s4 + $0x30] sm:$0xff] }
   0x4   :  { %514 = vmatpush3.bf16.msra.mxu1 %v28_v3  ;;  %v728_v9 = vpack.c.bf16 %v96_v6, %v95_v5  ;;  %v99_v11 = vld [vmem:[%s803_s4 + $0x20] sm:$0xff]  ;;  %v102_v15 = vld [vmem:[%s803_s4 + $0x38] sm:$0xff]  ;;  %v104_v18 = vld [vmem:[%s803_s4 + $0x48] sm:$0xff] }
   0x5   :  { %v607_v13 = vpack.c.bf16 %v100_v12, %v99_v11  ;;  %v611_v16 = vpack.c.bf16 %v102_v15, %v101_v14  ;;  %v103_v17 = vld [vmem:[%s803_s4 + $0x40] sm:$0xff]  ;;  %v105_v20 = vld [vmem:[%s803_s4 + $0x50] sm:$0xff]  ;;  %v106_v21 = vld [vmem:[%s803_s4 + $0x58] sm:$0xff] }
   0x6   :  { %600 = vmatprep.subr.bf16.mxu1 %v728_v9  ;;  %v615_v19 = vpack.c.bf16 %v104_v18, %v103_v17  ;;  %v619_v22 = vpack.c.bf16 %v106_v21, %v105_v20  ;;  %v107_v23 = vld [vmem:[%s803_s4 + $0x60] sm:$0xff]  ;;  %v108_v24 = vld [vmem:[%s803_s4 + $0x68] sm:$0xff]  ;;  %v109_v26 = vld [vmem:[%s803_s4 + $0x70] sm:$0xff] }
   0x7   :  { %516 = vmatmul.mubr.msk.bf16.vlgmr.msra.gmra.mrb[0].mxu1 %vm34_vm1, %v665_v4  ;;  %v623_v25 = vpack.c.bf16 %v108_v24, %v107_v23  ;;  %v110_v27 = vld [vmem:[%s803_s4 + $0x78] sm:$0xff]  ;;  %v462_v29 = vld [vmem:[%s804_s2 + $0x1] ss:$0 sm:$0xff]  ;;  %v461_v30 = vld [vmem:[%s804_s2] ss:$0 sm:$0xff] }
   0x8   :  { %602 = vmatpush3.bf16.msra.mxu1 %v728_v9  ;;  %v627_v28 = vpack.c.bf16 %v110_v27, %v109_v26  ;;  %v91_v31 = vmul.f32 %v462_v29, %v24_v1  ;;  %v92_v35 = vmul.f32 %v462_v29, %v25_v2  ;;  %v111_v41 = vld [vmem:[%s805_s5] sm:$0xff] }
   0x9   :  { %604 = vmatprep.subr.bf16.mxu1 %v730_v10  ;;  %554 = vmatprep.subr.mxu0 %v111_v41  ;;  %v467_v61 = vld [vmem:[%s806_s3] ss:$0 sm:$0xff]  ;;  %v468_v0 = vld [vmem:[%s806_s3 + $0x1] ss:$0 sm:$0xff] }
   0xa   :  { %555 = vmatpush3.msra.mxu0 %v111_v41 }
   0xb   :  { %632 = vmatprep.subr.bf16.mxu0 %v728_v9 }
   0xc   :  { %606 = vmatpush3.bf16.msra.mxu1 %v730_v10 }
   0xd   :  { %608 = vmatprep.subr.bf16.mxu1 %v607_v13 }
  0x10   :  { %610 = vmatpush3.bf16.msra.mxu1 %v607_v13 }
  0x11   :  { %612 = vmatprep.subr.bf16.mxu1 %v611_v16 }
  0x14   :  { %614 = vmatpush3.bf16.msra.mxu1 %v611_v16 }
  0x15   :  { %616 = vmatprep.subr.bf16.mxu1 %v615_v19 }
  0x18   :  { %618 = vmatpush3.bf16.msra.mxu1 %v615_v19 }
  0x19   :  { %620 = vmatprep.subr.bf16.mxu1 %v619_v22 }
  0x1c   :  { %622 = vmatpush3.bf16.msra.mxu1 %v619_v22 }
  0x1d   :  { %624 = vmatprep.subr.bf16.mxu1 %v623_v25 }
  0x20   :  { %626 = vmatpush3.bf16.msra.mxu1 %v623_v25 }
  0x21   :  { %628 = vmatprep.subr.bf16.mxu1 %v627_v28 }
  0x24   :  { %630 = vmatpush3.bf16.msra.mxu1 %v627_v28 }
  0xda   :  { %v72_v32 = vpop.f32.mrb[0].mxu1 }
  0xdb   :  { %v85_v33 = vmul.f32 %v461_v30, %v72_v32  ;;  %v517_v34 = vpop.f32.mrb[1].mxu1 }
  0xdc   :  { %v75_v36 = vpop.f32.mrb[2].mxu1 }
  0xdd   :  { %v93_v37 = vadd.f32 %v91_v31, %v85_v33  ;;  %v86_v38 = vmul.f32 %v461_v30, %v75_v36  ;;  %v518_v39 = vpop.f32.mrb[3].mxu1 }
  0xdf   :  { %v94_v40 = vadd.f32 %v92_v35, %v86_v38  ;;  %551 = vmatprep.mubr.f32.mxu1 %v93_v37 }
  0xe1   :  { %552 = vmatmul.mubr.f32.vlgmr.msra.gmra.mrb[4].mxu1 %v94_v40 }
 0x1b4   :  { %v553_v42 = vpop.f32.mrb[4].mxu1 }
 0x1b5   :  { %v178_v43 = vpop.f32.mrb[5].mxu1  ;;  %v188_v45 = vmul.f32 0.015625, %v553_v42 }
 0x1b6   :  { %v187_v44 = vmul.f32 0.015625, %v178_v43 }
 0x1b8   :  { %556 = vmatprep.mubr.msk.f32.mxu0 %vm189_vm2, %v187_v44 }
 0x1b9   :  { %557 = vmatmul.mubr.msk.f32.vlgmr.msra.gmra.mrb[0].mxu0 %vm189_vm2, %v188_v45 }
 0x1ba   :  { %634 = vmatpush3.bf16.msra.mxu0 %v728_v9 }
 0x1bb   :  { %636 = vmatprep.subr.bf16.mxu0 %v730_v10 }
 0x1be   :  { %638 = vmatpush3.bf16.msra.mxu0 %v730_v10 }
 0x1bf   :  { %640 = vmatprep.subr.bf16.mxu0 %v607_v13 }
 0x1c2   :  { %642 = vmatpush3.bf16.msra.mxu0 %v607_v13 }
 0x1c3   :  { %644 = vmatprep.subr.bf16.mxu0 %v611_v16 }
 0x1c6   :  { %646 = vmatpush3.bf16.msra.mxu0 %v611_v16 }
 0x1c7   :  { %648 = vmatprep.subr.bf16.mxu0 %v615_v19 }
 0x1ca   :  { %650 = vmatpush3.bf16.msra.mxu0 %v615_v19 }
 0x1cb   :  { %652 = vmatprep.subr.bf16.mxu0 %v619_v22 }
 0x1ce   :  { %654 = vmatpush3.bf16.msra.mxu0 %v619_v22 }
 0x1cf   :  { %656 = vmatprep.subr.bf16.mxu0 %v623_v25 }
 0x1d2   :  { %658 = vmatpush3.bf16.msra.mxu0 %v623_v25 }
 0x1d3   :  { %660 = vmatprep.subr.bf16.mxu0 %v627_v28 }
 0x1d6   :  { %662 = vmatpush3.bf16.msra.mxu0 %v627_v28 }
 0x1d7   :  { %594 = vmatprep.subr.mxu0 %v111_v41 }
 0x28c   :  { %v558_v46 = vpop.f32.mrb[0].mxu0 }
 0x28d   :  { %v272_v47 = vsub.f32 %v94_v40, %v558_v46  ;;  %v262_v48 = vpop.f32.mrb[1].mxu0 }
 0x28e   :  { %v271_v49 = vsub.f32 %v93_v37, %v262_v48 }
 0x28f   :  { %v274_v51 = vmul.f32 %v272_v47, %v272_v47 }
 0x290   :  { %v273_v50 = vmul.f32 %v271_v49, %v271_v49 }
 0x292   :  { %591 = vmatprep.mubr.f32.mxu0 %v273_v50 }
 0x293   :  { %592 = vmatmul.mubr.f32.vlgmr.msra.gmra.mrb[2].mxu0 %v274_v51 }
 0x294   :  { %595 = vmatpush3.msra.mxu0 %v111_v41 }
 0x366   :  { %v593_v52 = vpop.f32.mrb[2].mxu0 }
 0x367   :  { %v351_v53 = vmul.f32 0.015625, %v593_v52  ;;  %v341_v54 = vpop.f32.mrb[3].mxu0 }
 0x368   :  { %v350_v55 = vmul.f32 0.015625, %v341_v54 }
 0x369   :  { %v353_v56 = vadd.f32 1e-12, %v351_v53 }
 0x36a   :  { %v352_v57 = vadd.f32 1e-12, %v350_v55 }
 0x36c   :  { %666 = vrsqrt.f32 %v352_v57 }
 0x36d   :  { %668 = vrsqrt.f32 %v353_v56 }
 0x376   :  { %v667_v58 = vpop.eup %666 }
 0x377   :  { %v669_v59 = vpop.eup %668  ;;  %596 = vmatprep.mubr.msk.f32.mxu0 %vm189_vm2, %v667_v58 }
 0x378   :  { %597 = vmatmul.mubr.msk.f32.vlgmr.msra.gmra.mrb[4].mxu0 %vm189_vm2, %v669_v59 }
 0x44b   :  { %v598_v60 = vpop.f32.mrb[4].mxu0 }
 0x44c   :  { %v440_v62 = vmul.f32 %v598_v60, %v272_v47  ;;  %v428_v63 = vpop.f32.mrb[5].mxu0 }
 0x44d   :  { %v439_v1 = vmul.f32 %v428_v63, %v271_v49 }
 0x44e   :  { %v446_v2 = vmul.f32 %v467_v61, %v440_v62 }
 0x44f   :  { %v445_v3 = vmul.f32 %v467_v61, %v439_v1 }
 0x450   :  { %v452_v4 = vadd.f32 %v468_v0, %v446_v2 }
 0x451   :  { %v451_v5 = vadd.f32 %v468_v0, %v445_v3 }
 0x452   :  { %454 = vst [vmem:[%s807_s6 + $0x8] sm:$0xff] %v452_v4 }
 0x453   :  { %453 = vst [vmem:[%s807_s6] sm:$0xff] %v451_v5 }

</bundles_post_ra>
